<compile_context>
chip_gen: v6e
topology: v6e:2x2x1
jax: 0.10.0
libtpu: 0.0.40
codegen_flags: <defaults>
</compile_context>

<pallas_src>
import functools

import jax
import jax.numpy as jnp
from jax import lax
from jax.experimental import pallas as pl
from jax.experimental.pallas import tpu as pltpu


def _round_half_away_from_zero(x):
    # torchvision's roi_pool uses std::round (half away from zero).
    return jnp.sign(x) * jnp.floor(jnp.abs(x) + 0.5)


def _bin_window(dim, out_dim):
    # Max bin extent for an ROI inside the feature map:
    # ceil(dim / out_dim) + 1 (floor/ceil overhang), capped at dim.
    return int(min(dim, -(-dim // out_dim) + 1))


def _pick_ct(C, H, W, itemsize, budget_bytes):
    """Channel tile so one (1, H, W, Ct) block stays within the VMEM budget.

    Returns either the full C (legal layout: equals the array dim) or a
    multiple of 128 (legal layout for a partial last-dim block).  Never
    returns an over-budget full-C fallback.
    """
    per_channel = max(1, H * W * itemsize)
    max_ct = max(1, budget_bytes // per_channel)
    if C <= max_ct:
        return C
    if max_ct < 128:
        # Single channel slab already exceeds the budget; use the smallest
        # legal tile (full C if C < 128, else 128 lanes).
        return C if C < 128 else 128
    # Largest multiple of 128 <= max_ct, preferring minimal channel padding.
    best_ct, best_pad = 128, (-C) % 128
    ct = 256
    while ct <= max_ct:
        pad = (-C) % ct
        if pad < best_pad or (pad == best_pad and ct > best_ct):
            best_ct, best_pad = ct, pad
        ct += 128
    return best_ct


def _compute_bins(rois, H, W, out_h, out_w, spatial_scale, BH, BW):
    """Integer bin boundaries per ROI, mirroring the roi_pool CPU/CUDA kernel."""
    batch_idx = rois[:, 0].astype(jnp.int32)
    coords = _round_half_away_from_zero(
        rois[:, 1:5].astype(jnp.float32) * jnp.float32(spatial_scale)
    ).astype(jnp.int32)
    xs, ys, xe, ye = coords[:, 0], coords[:, 1], coords[:, 2], coords[:, 3]

    roi_w = jnp.maximum(xe - xs + 1, 1).astype(jnp.float32)
    roi_h = jnp.maximum(ye - ys + 1, 1).astype(jnp.float32)
    bin_h = roi_h / float(out_h)
    bin_w = roi_w / float(out_w)

    ph = jnp.arange(out_h, dtype=jnp.float32)
    hstart = jnp.floor(ph[None, :] * bin_h[:, None]).astype(jnp.int32) + ys[:, None]
    hend = jnp.ceil((ph[None, :] + 1.0) * bin_h[:, None]).astype(jnp.int32) + ys[:, None]
    hstart = jnp.clip(hstart, 0, H)
    hend = jnp.clip(hend, 0, H)
    # Keep each bin inside the kernel's static BH/BW windows (no-op for ROIs
    # inside the feature map).
    hend = jnp.minimum(hend, hstart + BH)

    pw = jnp.arange(out_w, dtype=jnp.float32)
    wstart = jnp.floor(pw[None, :] * bin_w[:, None]).astype(jnp.int32) + xs[:, None]
    wend = jnp.ceil((pw[None, :] + 1.0) * bin_w[:, None]).astype(jnp.int32) + xs[:, None]
    wstart = jnp.clip(wstart, 0, W)
    wend = jnp.clip(wend, 0, W)
    wend = jnp.minimum(wend, wstart + BW)

    return batch_idx, hstart, hend, wstart, wend


def _roi_pool_kernel(bounds_ref, fmap_ref, out_ref, rowmax_ref, *,
                     out_h, out_w, H, W, BH, BW, Kh, NCOL):
    # bounds_ref: SMEM flat int32 (K_pad * NCOL,) with per-ROI layout
    #   [batch_idx, orig_idx, hstart*out_h, hend*out_h, wstart*out_w, wend*out_w]
    # fmap_ref:   VMEM (1, H, W, Ct) channels-last slab of this ROI's image.
    # out_ref:    VMEM (1, out_h, out_w, Ct) scattered to the ROI's original row.
    # rowmax_ref: VMEM (W, Ct) f32 scratch for the staged row-max.
    core = pl.program_id(0)
    k = pl.program_id(2)
    base = (core * Kh + k) * NCOL
    flt_min = jnp.float32(jnp.finfo(jnp.float32).min)

    h_iota = lax.broadcasted_iota(jnp.int32, (BH, 1), 0)
    w_iota = lax.broadcasted_iota(jnp.int32, (BW, 1), 0)

    # Per-column-bin windows/masks are ph-invariant: hoist out of the ph loop.
    w_bins = []
    for pw in range(out_w):
        ws = bounds_ref[base + 2 + 2 * out_h + pw]
        we = bounds_ref[base + 2 + 2 * out_h + out_w + pw]
        w0 = jnp.minimum(ws, W - BW)
        ids = w0 + w_iota
        w_mask = (ids >= ws) & (ids < we)          # (BW, 1)
        w_bins.append((w0, w_mask, we <= ws))

    for ph in range(out_h):
        hs = bounds_ref[base + 2 + ph]
        he = bounds_ref[base + 2 + out_h + ph]
        h_empty = he <= hs
        h0 = jnp.minimum(hs, H - BH)               # bounded BH-row window
        h_ids = h0 + h_iota
        h_mask = (h_ids >= hs) & (h_ids < he)      # (BH, 1)

        rows = fmap_ref[0, pl.ds(h0, BH), :, :].astype(jnp.float32)   # (BH, W, Ct)
        rowmax_ref[...] = jnp.max(
            jnp.where(h_mask[:, :, None], rows, flt_min), axis=0)     # (W, Ct)

        for pw in range(out_w):
            w0, w_mask, w_empty = w_bins[pw]
            win = rowmax_ref[pl.ds(w0, BW), :]                         # (BW, Ct)
            v = jnp.max(jnp.where(w_mask, win, flt_min),
                        axis=0, keepdims=True)                         # (1, Ct)
            # torchvision: empty bins produce 0 (init is -FLT_MAX otherwise).
            v = jnp.where(jnp.logical_or(h_empty, w_empty),
                          jnp.float32(0.0), v)
            out_ref[0, ph, pl.ds(pw, 1), :] = v.astype(out_ref.dtype)


def roi_pool_pallas(feature_map, rois, output_size, spatial_scale=1.0, *,
                    channels_last=False,
                    vmem_block_budget_bytes=4 * 1024 * 1024):
    # TODO(synk): only the (K, 5) Tensor form of proposals is supported, not
    # the List[Tensor]-per-image form torchvision also accepts.
    out_h, out_w = output_size
    if channels_last:
        fmap_nhwc = feature_map
        N, H, W, C = feature_map.shape
    else:
        N, C, H, W = feature_map.shape
        # TODO(synk): this full-feature-map transpose costs about as much HBM
        # traffic as the kernel itself; pass channels_last=True with an NHWC
        # feature map to skip it.
        fmap_nhwc = jnp.transpose(feature_map, (0, 2, 3, 1))          # (N,H,W,C)

    K = int(rois.shape[0])
    BH = _bin_window(H, out_h)
    BW = _bin_window(W, out_w)
    NCOL = 2 + 2 * out_h + 2 * out_w

    batch_idx, hs, he, ws, we = _compute_bins(
        rois, H, W, out_h, out_w, spatial_scale, BH, BW)

    # Sort ROIs by image so consecutive grid steps map to the same feature-map
    # block (input DMA dedup).  Output is scattered directly back to the
    # original order via the orig-index column, so no un-sort gather is needed.
    cols = jnp.concatenate(
        [batch_idx[:, None],
         jnp.arange(K, dtype=jnp.int32)[:, None],
         hs, he, ws, we], axis=1).astype(jnp.int32)                   # (K, NCOL)
    order = jnp.argsort(batch_idx)
    cols = cols[order]

    # Pad ROI count to a multiple of 2 for the leading megacore split axis.
    K_pad = K + (K % 2)
    if K_pad != K:
        pad_rows = jnp.zeros((K_pad - K, NCOL), jnp.int32).at[:, 1].set(K)
        cols = jnp.concatenate([cols, pad_rows], axis=0)
    Kh = K_pad // 2
    bounds_flat = cols.reshape(-1)      # flat 1D SMEM table (no 128-col padding)

    # Channel tiling (lane axis); pad C to a multiple of the tile if needed.
    itemsize = jnp.dtype(feature_map.dtype).itemsize
    Ct = _pick_ct(C, H, W, itemsize, vmem_block_budget_bytes)
    C_pad = -(-C // Ct) * Ct
    if C_pad != C:
        fmap_nhwc = jnp.pad(fmap_nhwc, ((0, 0), (0, 0), (0, 0), (0, C_pad - C)))
    nC = C_pad // Ct

    grid_spec = pltpu.PrefetchScalarGridSpec(
        num_scalar_prefetch=1,          # bounds table -> SMEM (index_maps + body)
        grid=(2, nC, Kh),               # (core split, channel tile, ROI)
        in_specs=[
            pl.BlockSpec(
                (1, H, W, Ct),
                lambda core, c, k, b: (b[(core * Kh + k) * NCOL + 0], 0, 0, c)),
        ],
        out_specs=pl.BlockSpec(
            (1, out_h, out_w, Ct),
            lambda core, c, k, b: (b[(core * Kh + k) * NCOL + 1], 0, 0, c)),
        scratch_shapes=[pltpu.VMEM((W, Ct), jnp.float32)],
    )

    kernel = functools.partial(
        _roi_pool_kernel, out_h=out_h, out_w=out_w, H=H, W=W,
        BH=BH, BW=BW, Kh=Kh, NCOL=NCOL)

    out = pl.pallas_call(
        kernel,
        out_shape=jax.ShapeDtypeStruct((K_pad, out_h, out_w, C_pad),
                                       feature_map.dtype),
        grid_spec=grid_spec,
        compiler_params=pltpu.CompilerParams(
            dimension_semantics=("parallel", "arbitrary", "arbitrary")),
    )(bounds_flat, fmap_nhwc)

    out = out[:K, :, :, :C]                               # drop pad ROI / pad C
    if channels_last:
        return out                                        # (K, out_h, out_w, C)
    return jnp.transpose(out, (0, 3, 1, 2))               # (K, C, out_h, out_w)


def roi_pool_ref(feature_map, rois, output_size, spatial_scale=1.0):
    """Pure-JAX reference with identical semantics (for verification)."""
    out_h, out_w = output_size
    N, C, H, W = feature_map.shape
    BH = _bin_window(H, out_h)
    BW = _bin_window(W, out_w)
    bidx, hs, he, ws, we = _compute_bins(
        rois, H, W, out_h, out_w, spatial_scale, BH, BW)
    fm = feature_map[bidx].astype(jnp.float32)                       # (K,C,H,W)
    flt_min = jnp.finfo(jnp.float32).min
    h_idx = jnp.arange(H)
    w_idx = jnp.arange(W)
    mask_h = (h_idx[None, None, :] >= hs[:, :, None]) & \
             (h_idx[None, None, :] < he[:, :, None])                 # (K,oh,H)
    mask_w = (w_idx[None, None, :] >= ws[:, :, None]) & \
             (w_idx[None, None, :] < we[:, :, None])                 # (K,ow,W)
    tmp = jnp.max(jnp.where(mask_h[:, None, :, :, None],
                            fm[:, :, None, :, :], flt_min), axis=3)  # (K,C,oh,W)
    pooled = jnp.max(jnp.where(mask_w[:, None, None, :, :],
                               tmp[:, :, :, None, :], flt_min), axis=4)
    empty = (he <= hs)[:, None, :, None] | (we <= ws)[:, None, None, :]
    pooled = jnp.where(empty, 0.0, pooled)
    return pooled.astype(feature_map.dtype)


if __name__ == "__main__":
    key = jax.random.PRNGKey(0)
    N, C, H, W = 2, 4, 16, 16
    output_size = (2, 2)          # ROIPoolingLayer(output_size=(2, 2))

    feature_map = jax.random.normal(key, (N, C, H, W), dtype=jnp.float32)
    # proposals: (K, 5) rows of [batch_idx, x1, y1, x2, y2] in feature coords.
    proposals = jnp.array([
        [0.0, 0.0, 0.0, 7.0, 7.0],
        [1.0, 2.0, 3.0, 10.0, 12.0],
        [0.0, 4.0, 4.0, 15.0, 15.0],
        [1.0, 0.0, 8.0, 15.0, 15.0],
    ], dtype=jnp.float32)

    out = roi_pool_pallas(feature_map, proposals, output_size)
    out = jax.block_until_ready(out)

    ref = roi_pool_ref(feature_map, proposals, output_size)
    assert out.shape == (proposals.shape[0], C, *output_size)
    assert jnp.allclose(out, ref, atol=1e-5), "Pallas roi_pool mismatch vs reference"
    print("KERNEL_OK")
</pallas_src>

<mosaic_0001>
module attributes {stable_mosaic.version = 11 : i64} {
  func.func @_roi_pool_kernel(%arg0: i32, %arg1: i32, %arg2: i32, %arg3: memref<40xi32, #tpu.memory_space<smem>>, %arg4: memref<1x16x16x4xf32, #tpu.memory_space<vmem>>, %arg5: memref<1x2x2x4xf32, #tpu.memory_space<vmem>>, %arg6: memref<16x4xf32, #tpu.memory_space<vmem>>) attributes {dimension_semantics = [#tpu.dimension_semantics<parallel>, #tpu.dimension_semantics<arbitrary>, #tpu.dimension_semantics<arbitrary>], iteration_bounds = array<i64: 2, 1, 2>, scalar_prefetch = 1 : i64, scratch_operands = 1 : i64, tpu.core_type = #tpu.core_type<tc>, window_params = [{transform_indices = @transform_0, window_bounds = array<i64: 1, 16, 16, 4>}, {transform_indices = @transform_1, window_bounds = array<i64: 1, 2, 2, 4>}]} {
    %c2_i32 = arith.constant 2 : i32
    %0 = arith.muli %arg0, %c2_i32 : i32
    %1 = arith.addi %0, %arg2 : i32
    %c10_i32 = arith.constant 10 : i32
    %2 = arith.muli %1, %c10_i32 : i32
    %3 = tpu.iota {dimensions = array<i32: 0>} : vector<9x1xi32>
    %4 = tpu.iota {dimensions = array<i32: 0>} : vector<9x1xi32>
    %c2_i32_0 = arith.constant 2 : i32
    %5 = arith.addi %2, %c2_i32_0 : i32
    %c4_i32 = arith.constant 4 : i32
    %6 = arith.addi %5, %c4_i32 : i32
    %c0_i32 = arith.constant 0 : i32
    %7 = arith.addi %6, %c0_i32 : i32
    %8 = arith.index_cast %7 : i32 to index
    %9 = memref.load %arg3[%8] : memref<40xi32, #tpu.memory_space<smem>>
    %c2_i32_1 = arith.constant 2 : i32
    %10 = arith.addi %2, %c2_i32_1 : i32
    %c4_i32_2 = arith.constant 4 : i32
    %11 = arith.addi %10, %c4_i32_2 : i32
    %c2_i32_3 = arith.constant 2 : i32
    %12 = arith.addi %11, %c2_i32_3 : i32
    %c0_i32_4 = arith.constant 0 : i32
    %13 = arith.addi %12, %c0_i32_4 : i32
    %14 = arith.index_cast %13 : i32 to index
    %15 = memref.load %arg3[%14] : memref<40xi32, #tpu.memory_space<smem>>
    %c7_i32 = arith.constant 7 : i32
    %16 = arith.minsi %9, %c7_i32 : i32
    %17 = vector.broadcast %16 : i32 to vector<9x1xi32>
    %18 = arith.addi %17, %4 : vector<9x1xi32>
    %19 = vector.broadcast %9 : i32 to vector<9x1xi32>
    %20 = arith.cmpi sge, %18, %19 : vector<9x1xi32>
    %21 = vector.broadcast %15 : i32 to vector<9x1xi32>
    %22 = arith.cmpi slt, %18, %21 : vector<9x1xi32>
    %23 = arith.andi %20, %22 : vector<9x1xi1>
    %24 = arith.cmpi sle, %15, %9 : i32
    %c2_i32_5 = arith.constant 2 : i32
    %25 = arith.addi %2, %c2_i32_5 : i32
    %c4_i32_6 = arith.constant 4 : i32
    %26 = arith.addi %25, %c4_i32_6 : i32
    %c1_i32 = arith.constant 1 : i32
    %27 = arith.addi %26, %c1_i32 : i32
    %28 = arith.index_cast %27 : i32 to index
    %29 = memref.load %arg3[%28] : memref<40xi32, #tpu.memory_space<smem>>
    %c2_i32_7 = arith.constant 2 : i32
    %30 = arith.addi %2, %c2_i32_7 : i32
    %c4_i32_8 = arith.constant 4 : i32
    %31 = arith.addi %30, %c4_i32_8 : i32
    %c2_i32_9 = arith.constant 2 : i32
    %32 = arith.addi %31, %c2_i32_9 : i32
    %c1_i32_10 = arith.constant 1 : i32
    %33 = arith.addi %32, %c1_i32_10 : i32
    %34 = arith.index_cast %33 : i32 to index
    %35 = memref.load %arg3[%34] : memref<40xi32, #tpu.memory_space<smem>>
    %c7_i32_11 = arith.constant 7 : i32
    %36 = arith.minsi %29, %c7_i32_11 : i32
    %37 = vector.broadcast %36 : i32 to vector<9x1xi32>
    %38 = arith.addi %37, %4 : vector<9x1xi32>
    %39 = vector.broadcast %29 : i32 to vector<9x1xi32>
    %40 = arith.cmpi sge, %38, %39 : vector<9x1xi32>
    %41 = vector.broadcast %35 : i32 to vector<9x1xi32>
    %42 = arith.cmpi slt, %38, %41 : vector<9x1xi32>
    %43 = arith.andi %40, %42 : vector<9x1xi1>
    %44 = arith.cmpi sle, %35, %29 : i32
    %c2_i32_12 = arith.constant 2 : i32
    %45 = arith.addi %2, %c2_i32_12 : i32
    %c0_i32_13 = arith.constant 0 : i32
    %46 = arith.addi %45, %c0_i32_13 : i32
    %47 = arith.index_cast %46 : i32 to index
    %48 = memref.load %arg3[%47] : memref<40xi32, #tpu.memory_space<smem>>
    %c2_i32_14 = arith.constant 2 : i32
    %49 = arith.addi %2, %c2_i32_14 : i32
    %c2_i32_15 = arith.constant 2 : i32
    %50 = arith.addi %49, %c2_i32_15 : i32
    %c0_i32_16 = arith.constant 0 : i32
    %51 = arith.addi %50, %c0_i32_16 : i32
    %52 = arith.index_cast %51 : i32 to index
    %53 = memref.load %arg3[%52] : memref<40xi32, #tpu.memory_space<smem>>
    %54 = arith.cmpi sle, %53, %48 : i32
    %c7_i32_17 = arith.constant 7 : i32
    %55 = arith.minsi %48, %c7_i32_17 : i32
    %56 = vector.broadcast %55 : i32 to vector<9x1xi32>
    %57 = arith.addi %56, %3 : vector<9x1xi32>
    %58 = vector.broadcast %48 : i32 to vector<9x1xi32>
    %59 = arith.cmpi sge, %57, %58 : vector<9x1xi32>
    %60 = vector.broadcast %53 : i32 to vector<9x1xi32>
    %61 = arith.cmpi slt, %57, %60 : vector<9x1xi32>
    %62 = arith.andi %59, %61 : vector<9x1xi1>
    %c0 = arith.constant 0 : index
    %63 = arith.index_cast %55 : i32 to index
    %c0_18 = arith.constant 0 : index
    %c0_19 = arith.constant 0 : index
    %64 = vector.load %arg4[%c0, %63, %c0_18, %c0_19] : memref<1x16x16x4xf32, #tpu.memory_space<vmem>>, vector<1x9x16x4xf32>
    %65 = vector.shape_cast %64 : vector<1x9x16x4xf32> to vector<9x16x4xf32>
    %66 = vector.shape_cast %62 : vector<9x1xi1> to vector<9x1x1xi1>
    %cst = arith.constant -3.40282347E+38 : f32
    %67 = vector.shape_cast %66 : vector<9x1x1xi1> to vector<9x1x1xi1>
    %68 = vector.broadcast %67 : vector<9x1x1xi1> to vector<9x16x4xi1>
    %69 = vector.broadcast %cst : f32 to vector<9x16x4xf32>
    %70 = arith.select %68, %65, %69 : vector<9x16x4xi1>, vector<9x16x4xf32>
    %cst_20 = arith.constant dense<0xFF800000> : vector<16x4xf32>
    %71 = vector.multi_reduction <maximumf>, %70, %cst_20 [0] : vector<9x16x4xf32> to vector<16x4xf32>
    %c0_21 = arith.constant 0 : index
    %c0_22 = arith.constant 0 : index
    %72 = vector.load %arg6[%c0_21, %c0_22] : memref<16x4xf32, #tpu.memory_space<vmem>>, vector<16x4xf32>
    tpu.vector_store %arg6[%c0_21, %c0_22], %71 {strides = array<i32>} : memref<16x4xf32, #tpu.memory_space<vmem>>, vector<16x4xf32>,
    %73 = arith.index_cast %16 : i32 to index
    %c0_23 = arith.constant 0 : index
    %74 = vector.load %arg6[%73, %c0_23] : memref<16x4xf32, #tpu.memory_space<vmem>>, vector<9x4xf32>
    %cst_24 = arith.constant -3.40282347E+38 : f32
    %75 = vector.shape_cast %23 : vector<9x1xi1> to vector<9x1xi1>
    %76 = vector.broadcast %75 : vector<9x1xi1> to vector<9x4xi1>
    %77 = vector.broadcast %cst_24 : f32 to vector<9x4xf32>
    %78 = arith.select %76, %74, %77 : vector<9x4xi1>, vector<9x4xf32>
    %cst_25 = arith.constant dense<0xFF800000> : vector<4xf32>
    %79 = vector.multi_reduction <maximumf>, %78, %cst_25 [0] : vector<9x4xf32> to vector<4xf32>
    %80 = vector.shape_cast %79 : vector<4xf32> to vector<1x4xf32>
    %81 = arith.ori %54, %24 : i1
    %cst_26 = arith.constant 0.000000e+00 : f32
    %82 = vector.broadcast %cst_26 : f32 to vector<1x4xf32>
    %83 = arith.select %81, %82, %80 : vector<1x4xf32>
    %c0_27 = arith.constant 0 : index
    %c0_28 = arith.constant 0 : index
    %c0_29 = arith.constant 0 : index
    %c0_30 = arith.constant 0 : index
    %84 = vector.load %arg5[%c0_27, %c0_28, %c0_29, %c0_30] : memref<1x2x2x4xf32, #tpu.memory_space<vmem>>, vector<1x1x1x4xf32>
    %85 = vector.shape_cast %84 : vector<1x1x1x4xf32> to vector<1x4xf32>
    %86 = vector.shape_cast %83 : vector<1x4xf32> to vector<1x1x1x4xf32>
    tpu.vector_store %arg5[%c0_27, %c0_28, %c0_29, %c0_30], %86 {strides = array<i32>} : memref<1x2x2x4xf32, #tpu.memory_space<vmem>>, vector<1x1x1x4xf32>,
    %87 = arith.index_cast %36 : i32 to index
    %c0_31 = arith.constant 0 : index
    %88 = vector.load %arg6[%87, %c0_31] : memref<16x4xf32, #tpu.memory_space<vmem>>, vector<9x4xf32>
    %cst_32 = arith.constant -3.40282347E+38 : f32
    %89 = vector.shape_cast %43 : vector<9x1xi1> to vector<9x1xi1>
    %90 = vector.broadcast %89 : vector<9x1xi1> to vector<9x4xi1>
    %91 = vector.broadcast %cst_32 : f32 to vector<9x4xf32>
    %92 = arith.select %90, %88, %91 : vector<9x4xi1>, vector<9x4xf32>
    %cst_33 = arith.constant dense<0xFF800000> : vector<4xf32>
    %93 = vector.multi_reduction <maximumf>, %92, %cst_33 [0] : vector<9x4xf32> to vector<4xf32>
    %94 = vector.shape_cast %93 : vector<4xf32> to vector<1x4xf32>
    %95 = arith.ori %54, %44 : i1
    %cst_34 = arith.constant 0.000000e+00 : f32
    %96 = vector.broadcast %cst_34 : f32 to vector<1x4xf32>
    %97 = arith.select %95, %96, %94 : vector<1x4xf32>
    %c0_35 = arith.constant 0 : index
    %c0_36 = arith.constant 0 : index
    %c1 = arith.constant 1 : index
    %c0_37 = arith.constant 0 : index
    %98 = vector.load %arg5[%c0_35, %c0_36, %c1, %c0_37] : memref<1x2x2x4xf32, #tpu.memory_space<vmem>>, vector<1x1x1x4xf32>
    %99 = vector.shape_cast %98 : vector<1x1x1x4xf32> to vector<1x4xf32>
    %100 = vector.shape_cast %97 : vector<1x4xf32> to vector<1x1x1x4xf32>
    tpu.vector_store %arg5[%c0_35, %c0_36, %c1, %c0_37], %100 {strides = array<i32>} : memref<1x2x2x4xf32, #tpu.memory_space<vmem>>, vector<1x1x1x4xf32>,
    %c2_i32_38 = arith.constant 2 : i32
    %101 = arith.addi %2, %c2_i32_38 : i32
    %c1_i32_39 = arith.constant 1 : i32
    %102 = arith.addi %101, %c1_i32_39 : i32
    %103 = arith.index_cast %102 : i32 to index
    %104 = memref.load %arg3[%103] : memref<40xi32, #tpu.memory_space<smem>>
    %c2_i32_40 = arith.constant 2 : i32
    %105 = arith.addi %2, %c2_i32_40 : i32
    %c2_i32_41 = arith.constant 2 : i32
    %106 = arith.addi %105, %c2_i32_41 : i32
    %c1_i32_42 = arith.constant 1 : i32
    %107 = arith.addi %106, %c1_i32_42 : i32
    %108 = arith.index_cast %107 : i32 to index
    %109 = memref.load %arg3[%108] : memref<40xi32, #tpu.memory_space<smem>>
    %110 = arith.cmpi sle, %109, %104 : i32
    %c7_i32_43 = arith.constant 7 : i32
    %111 = arith.minsi %104, %c7_i32_43 : i32
    %112 = vector.broadcast %111 : i32 to vector<9x1xi32>
    %113 = arith.addi %112, %3 : vector<9x1xi32>
    %114 = vector.broadcast %104 : i32 to vector<9x1xi32>
    %115 = arith.cmpi sge, %113, %114 : vector<9x1xi32>
    %116 = vector.broadcast %109 : i32 to vector<9x1xi32>
    %117 = arith.cmpi slt, %113, %116 : vector<9x1xi32>
    %118 = arith.andi %115, %117 : vector<9x1xi1>
    %c0_44 = arith.constant 0 : index
    %119 = arith.index_cast %111 : i32 to index
    %c0_45 = arith.constant 0 : index
    %c0_46 = arith.constant 0 : index
    %120 = vector.load %arg4[%c0_44, %119, %c0_45, %c0_46] : memref<1x16x16x4xf32, #tpu.memory_space<vmem>>, vector<1x9x16x4xf32>
    %121 = vector.shape_cast %120 : vector<1x9x16x4xf32> to vector<9x16x4xf32>
    %122 = vector.shape_cast %118 : vector<9x1xi1> to vector<9x1x1xi1>
    %cst_47 = arith.constant -3.40282347E+38 : f32
    %123 = vector.shape_cast %122 : vector<9x1x1xi1> to vector<9x1x1xi1>
    %124 = vector.broadcast %123 : vector<9x1x1xi1> to vector<9x16x4xi1>
    %125 = vector.broadcast %cst_47 : f32 to vector<9x16x4xf32>
    %126 = arith.select %124, %121, %125 : vector<9x16x4xi1>, vector<9x16x4xf32>
    %cst_48 = arith.constant dense<0xFF800000> : vector<16x4xf32>
    %127 = vector.multi_reduction <maximumf>, %126, %cst_48 [0] : vector<9x16x4xf32> to vector<16x4xf32>
    %c0_49 = arith.constant 0 : index
    %c0_50 = arith.constant 0 : index
    %128 = vector.load %arg6[%c0_49, %c0_50] : memref<16x4xf32, #tpu.memory_space<vmem>>, vector<16x4xf32>
    tpu.vector_store %arg6[%c0_49, %c0_50], %127 {strides = array<i32>} : memref<16x4xf32, #tpu.memory_space<vmem>>, vector<16x4xf32>,
    %129 = arith.index_cast %16 : i32 to index
    %c0_51 = arith.constant 0 : index
    %130 = vector.load %arg6[%129, %c0_51] : memref<16x4xf32, #tpu.memory_space<vmem>>, vector<9x4xf32>
    %cst_52 = arith.constant -3.40282347E+38 : f32
    %131 = vector.shape_cast %23 : vector<9x1xi1> to vector<9x1xi1>
    %132 = vector.broadcast %131 : vector<9x1xi1> to vector<9x4xi1>
    %133 = vector.broadcast %cst_52 : f32 to vector<9x4xf32>
    %134 = arith.select %132, %130, %133 : vector<9x4xi1>, vector<9x4xf32>
    %cst_53 = arith.constant dense<0xFF800000> : vector<4xf32>
    %135 = vector.multi_reduction <maximumf>, %134, %cst_53 [0] : vector<9x4xf32> to vector<4xf32>
    %136 = vector.shape_cast %135 : vector<4xf32> to vector<1x4xf32>
    %137 = arith.ori %110, %24 : i1
    %cst_54 = arith.constant 0.000000e+00 : f32
    %138 = vector.broadcast %cst_54 : f32 to vector<1x4xf32>
    %139 = arith.select %137, %138, %136 : vector<1x4xf32>
    %c0_55 = arith.constant 0 : index
    %c1_56 = arith.constant 1 : index
    %c0_57 = arith.constant 0 : index
    %c0_58 = arith.constant 0 : index
    %140 = vector.load %arg5[%c0_55, %c1_56, %c0_57, %c0_58] : memref<1x2x2x4xf32, #tpu.memory_space<vmem>>, vector<1x1x1x4xf32>
    %141 = vector.shape_cast %140 : vector<1x1x1x4xf32> to vector<1x4xf32>
    %142 = vector.shape_cast %139 : vector<1x4xf32> to vector<1x1x1x4xf32>
    tpu.vector_store %arg5[%c0_55, %c1_56, %c0_57, %c0_58], %142 {strides = array<i32>} : memref<1x2x2x4xf32, #tpu.memory_space<vmem>>, vector<1x1x1x4xf32>,
    %143 = arith.index_cast %36 : i32 to index
    %c0_59 = arith.constant 0 : index
    %144 = vector.load %arg6[%143, %c0_59] : memref<16x4xf32, #tpu.memory_space<vmem>>, vector<9x4xf32>
    %cst_60 = arith.constant -3.40282347E+38 : f32
    %145 = vector.shape_cast %43 : vector<9x1xi1> to vector<9x1xi1>
    %146 = vector.broadcast %145 : vector<9x1xi1> to vector<9x4xi1>
    %147 = vector.broadcast %cst_60 : f32 to vector<9x4xf32>
    %148 = arith.select %146, %144, %147 : vector<9x4xi1>, vector<9x4xf32>
    %cst_61 = arith.constant dense<0xFF800000> : vector<4xf32>
    %149 = vector.multi_reduction <maximumf>, %148, %cst_61 [0] : vector<9x4xf32> to vector<4xf32>
    %150 = vector.shape_cast %149 : vector<4xf32> to vector<1x4xf32>
    %151 = arith.ori %110, %44 : i1
    %cst_62 = arith.constant 0.000000e+00 : f32
    %152 = vector.broadcast %cst_62 : f32 to vector<1x4xf32>
    %153 = arith.select %151, %152, %150 : vector<1x4xf32>
    %c0_63 = arith.constant 0 : index
    %c1_64 = arith.constant 1 : index
    %c1_65 = arith.constant 1 : index
    %c0_66 = arith.constant 0 : index
    %154 = vector.load %arg5[%c0_63, %c1_64, %c1_65, %c0_66] : memref<1x2x2x4xf32, #tpu.memory_space<vmem>>, vector<1x1x1x4xf32>
    %155 = vector.shape_cast %154 : vector<1x1x1x4xf32> to vector<1x4xf32>
    %156 = vector.shape_cast %153 : vector<1x4xf32> to vector<1x1x1x4xf32>
    tpu.vector_store %arg5[%c0_63, %c1_64, %c1_65, %c0_66], %156 {strides = array<i32>} : memref<1x2x2x4xf32, #tpu.memory_space<vmem>>, vector<1x1x1x4xf32>,
    return
  }
  func.func @transform_0(%arg0: i32, %arg1: i32, %arg2: i32, %arg3: memref<40xi32, #tpu.memory_space<smem>>) -> (i32, i32, i32, i32) {
    %c2_i32 = arith.constant 2 : i32
    %0 = arith.muli %arg0, %c2_i32 : i32
    %1 = arith.addi %0, %arg2 : i32
    %c10_i32 = arith.constant 10 : i32
    %2 = arith.muli %1, %c10_i32 : i32
    %c0_i32 = arith.constant 0 : i32
    %3 = arith.addi %2, %c0_i32 : i32
    %4 = arith.index_cast %3 : i32 to index
    %5 = memref.load %arg3[%4] : memref<40xi32, #tpu.memory_space<smem>>
    %c0_i32_0 = arith.constant 0 : i32
    %c0_i32_1 = arith.constant 0 : i32
    %c0_i32_2 = arith.constant 0 : i32
    return %5, %c0_i32_0, %c0_i32_1, %arg1 : i32, i32, i32, i32
  }
  func.func @transform_1(%arg0: i32, %arg1: i32, %arg2: i32, %arg3: memref<40xi32, #tpu.memory_space<smem>>) -> (i32, i32, i32, i32) {
    %c2_i32 = arith.constant 2 : i32
    %0 = arith.muli %arg0, %c2_i32 : i32
    %1 = arith.addi %0, %arg2 : i32
    %c10_i32 = arith.constant 10 : i32
    %2 = arith.muli %1, %c10_i32 : i32
    %c1_i32 = arith.constant 1 : i32
    %3 = arith.addi %2, %c1_i32 : i32
    %4 = arith.index_cast %3 : i32 to index
    %5 = memref.load %arg3[%4] : memref<40xi32, #tpu.memory_space<smem>>
    %c0_i32 = arith.constant 0 : i32
    %c0_i32_0 = arith.constant 0 : i32
    %c0_i32_1 = arith.constant 0 : i32
    return %5, %c0_i32, %c0_i32_0, %arg1 : i32, i32, i32, i32
  }
}

</mosaic_0001>

<bundles_post_ra>
// kernel: tpu_custom_call.1
= control target key start
LH: loop header
LB: loop body
LE: loop exit
PB: predicated region body
PF: predicated region fallthrough
CT: control target
= control target key end

     0   :  { %s1641_s0 = inlined_call_operand.vmem [shape: s32[40], index: 0, kind: input, shape index: {}]   ;;  %s1642_s1 = inlined_call_operand.vmem [shape: f32[2,16,16,4], index: 1, kind: input, shape index: {}]   ;;  %s1643_s2 = inlined_call_operand.hbm [shape: f32[4,2,2,4], index: 2, kind: output, shape index: {}]  }
   0x1   :  { %s7_s11 = sshll.u32 %s1641_s0, 4  ;;  %s8_s11 = int_to_ptr.vmem [resolvable:$true] %s7_s11 }
   0x2   :  { %s855_s12 = scalar_lea.vmem %s8_s11, 16  ;;  %p860_p1 = scmp.lt.s32.totalorder %s8_s11, %s8_s11 }
   0x3   :  { %p856_p0 = scmp.ne.s32.totalorder %s8_s11, %s855_s12  ;;  %p861_p2 = scmp.lt.s32.totalorder %s855_s12, %s855_s12 }
   0x5   :  { %p862_p3 = por %p861_p2, %p860_p1 }
   0x7   :  { %p863_p4 = pnand %p862_p3, %p856_p0 }
   0x9   :  { %866 = shalt.err (!%p863_p4)  }
   0xa   :  { %s963_s13 = smov [#allocation4]  }
   0xb   :  { %10 = dma.vmem_to_smem %s8_s11, 16, %s963_s13, [#allocation3] }
   0xc   :  { %925 = dma.done.wait [#allocation3], 16 }
   0xd   :  { %926 = vsyncadd [#allocation3], 4294967280 }
   0xe   :  { %12 = sfence }
   0xf   :  { %13 = vsyncpa [#allocation6], 0 }
  0x10   :  { %15 = vsyncpa [#allocation6 + $0x1], 0  ;;  %s986_s14 = smov 0   ;;  %s988_s15 = smov 0  }
  0x11   :  { %s990_s0 = smov 0   ;;  %s992_s16 = smov 0  }
  0x12   :  { %s994_s17 = smov 0   ;;  %s996_s18 = smov 0  }
  0x13   :  { %s998_s19 = smov 0   ;;  %s1000_s20 = smov 0  }
  0x14 LB: > { %s33_s21 = sadd.s32 1, %s953_s18  ;;  %s40_s22 = sadd.s32 1, %s957_s19  ;;  %s961_s20 = sphi %s1000_s20, %s21_s20   ;;  %s957_s19 = sphi %s998_s19, %s1686_s19   ;;  %s953_s18 = sphi %s996_s18, %s1685_s18   ;;  %s949_s17 = sphi %s994_s17, %s1684_s17   ;;  %s945_s16 = sphi %s992_s16, %s1683_s16   ;;  %s941_s0 = sphi %s990_s0, %s1682_s0   ;;  %s937_s15 = sphi %s988_s15, %s1681_s15   ;;  %s933_s14 = sphi %s986_s14, %s1680_s14  }
  0x15   : > { %p34_p5 = scmp.ge.s32.totalorder %s33_s21, 2  ;;  %s756_s23 = sshll.u32 %s957_s19, 1 }
  0x16   : > { %s752_s24 = sadd.s32 4294967295, %s961_s20   ;;  %s81_s25 = sadd.s32 %s953_s18, %s756_s23 }
  0x17   : > { %s1688_s21 = smov (%p34_p5, %s33_s21), 0  ;;  %s1690_s22 = smov (!%p34_p5, %s40_s22), %s957_s19 }
  0x18   : > { %s82_s26 = smul.u32 10, %s81_s25  ;;  %p105_p6 = scmp.ne.s32.totalorder %s941_s0, %s937_s15 }
  0x19   : > { %p42_p7 = scmp.ge.s32.totalorder %s1690_s22, 2  ;;  %p106_p8 = scmp.eq.s32.totalorder %s752_s24, 3 }
  0x1a   : > { %s753_s27 = sadd.s32 4294967294, %s961_s20   ;;  %p111_p9 = scmp.ne.s32.totalorder %s937_s15, %s933_s14 }
  0x1b   : > { %s1692_s22 = smov (%p42_p7, %s1690_s22), 0  ;;  %s83_s28 = sadd.s32 1, %s82_s26 }
  0x1c   : > { %p1041_p10 = por %p106_p8, %p105_p6  ;;  %s757_s30 = sshll.u32 %s1692_s22, 1 }
  0x1d   : > { %p112_p11 = scmp.eq.s32.totalorder %s753_s27, 3  ;;  %s86_s3 = sadd.s32 %s757_s30, %s1688_s21 }
  0x1e   : > { %p760_p12 = scmp.ge.s32.totalorder %s961_s20, 1  ;;  %s87_s4 = smul.u32 10, %s86_s3 }
  0x1f   : > { %p1048_p13 = por %p112_p11, %p111_p9  ;;  %s84_s6 = sld [smem:[#allocation4 + %s83_s28]] }
  0x20   : > { %p149_p0 = scmp.lt.s32.totalorder %s961_s20, 5  ;;  %s88_s7 = sadd.s32 1, %s87_s4 }
  0x21   : > { %s89_s8 = sld [smem:[#allocation4 + %s88_s7]]  ;;  %s95_s10 = sadd.s32 1, %s941_s0 }
  0x22   : > { %p150_p1 = pnand %p760_p12, %p149_p0 }
  0x23   : > { %s762_s12 = sshll.u32 (!%p150_p1), %s949_s17, 1 }
  0x24   : > { %s177_s13 = sadd.s32 (!%p150_p1), %s945_s16, %s762_s12 }
  0x25   : > { %s1059_s23 = smul.u32 (!%p150_p1), 10, %s177_s13 }
  0x26   : > { %153 = sbr.rel (%p150_p1) target bundleno = 146 (0x92), region = 24 }
  0x27   : > { %s90_s9 = ssub.s32 %s84_s6, %s89_s8  ;;  %s179_s24 = sld [smem:[#allocation4 + %s1059_s23]] (!%p150_p1) }
  0x28   : > { %p93_p2 = scmp.eq.s32.totalorder %s90_s9, 0  ;;  %s239_s25 = sadd.s32 (!%p150_p1), 2, %s1059_s23 }
  0x29   : > { %s1063_s26 = sld [smem:[#allocation4 + %s239_s25]] (!%p150_p1)  ;;  %s241_s27 = sadd.s32 (!%p150_p1), 4, %s1059_s23 }
  0x2a   : > { %s1055_s11 = scalar_select %p93_p2, %s941_s0, %s95_s10  }
  0x2b   : > { %v200_v0 = vlaneseq  ;;  %s1066_s28 = sld [smem:[#allocation4 + %s241_s27]]  ;;  %s446_s16 = sadd.s32 3, %s1059_s23  ;;  %v964_v17 = vmov 0   ;;  %vm360_vm6 = vcmask 31744  }
  0x2c   : > { %s1069_s17 = sld [smem:[#allocation4 + %s446_s16]]  ;;  %s448_s30 = sadd.s32 5, %s1059_s23 }
  0x2d   : > { %p180_p3 = scmp.lt.s32.totalorder %s179_s24, 1  ;;  %v1071_v1 = vshrl.u32 %v200_v0, 7  ;;  %s1085_s6 = sld [smem:[#allocation4 + %s448_s30]] }
  0x2e   : > { %s221_s27 = sadd.s32 7, %s1059_s23  ;;  %s205_s7 = sadd.s32 8, %s1059_s23 }
  0x2f   : > { %p244_p4 = scmp.lt.s32.totalorder %s1063_s26, 7  ;;  %s1694_s24 = smov (!%p180_p3, %s179_s24), 1  ;;  %v1076_v2 = vadd.s32 8, %v1071_v1  ;;  %v249_v4 = vstv %s1063_s26  ;;  %v1083_v6 = vsub.s32 0, %v1071_v1  ;;  %v285_v9 = vsub.s32 1, %v1071_v1 }
  0x30   : > { %s776_s4 = sshll.u32 %s1694_s24, 8  ;;  %v289_v10 = vsub.s32 2, %v1071_v1  ;;  %v293_v11 = vsub.s32 3, %v1071_v1  ;;  %v297_v12 = vsub.s32 4, %v1071_v1  ;;  %v301_v13 = vsub.s32 5, %v1071_v1  ;;  %s203_s24 = sadd.s32 6, %s1059_s23 }
  0x31   : > { %s245_s3 = scalar_select %p244_p4, %s1063_s26, 7  ;;  %v252_v5 = vstv %s1066_s28  ;;  %v305_v14 = vsub.s32 6, %v1071_v1  ;;  %v309_v15 = vsub.s32 7, %v1071_v1 }
  0x32   : > { %p451_p5 = scmp.lt.s32.totalorder %s1069_s17, 7  ;;  %s1090_s9 = scalar_lea.vmem %s1642_s1, %s776_s4  ;;  %v456_v20 = vstv %s1069_s17 }
  0x33   : > { %v246_v3 = vstv %s245_s3  ;;  %s766_s10 = sshll.u32 %s245_s3, 4  ;;  %p243_p6 = scmp.le.s32.totalorder %s1066_s28, %s1063_s26  ;;  %v459_v41 = vstv %s1085_s6 }
  0x34   : > { %v247_v7 = vadd.s32 %v246_v3, %v1071_v1  ;;  %v248_v8 = vadd.s32 %v246_v3, %v1076_v2  ;;  %s1103_s12 = scalar_select %p451_p5, %s1069_s17, 7 }
  0x35   : > { %s1106_s13 = scalar_lea.vmem %s1090_s9, %s766_s10  ;;  %s1156_s25 = sld [smem:[#allocation4 + %s203_s24]] }
  0x36   : > { %vm250_vm0 = vcmp.ge.s32.totalorder %v247_v7, %v249_v4  ;;  %vm251_vm1 = vcmp.ge.s32.totalorder %v248_v8, %v249_v4  ;;  %vm253_vm2 = vcmp.lt.s32.totalorder %v247_v7, %v252_v5  ;;  %vm254_vm3 = vcmp.lt.s32.totalorder %v248_v8, %v252_v5  ;;  %v259_v25 = vld [vmem:[%s1106_s13] sm:$0xff]  ;;  %v261_v30 = vld [vmem:[%s1106_s13 + $0x10] sm:$0xff]  ;;  %s1214_s16 = sld [smem:[#allocation4 + %s221_s27]]  ;;  %s767_s30 = sshll.u32 %s1103_s12, 4  ;;  %v268_v4 = vld [vmem:[%s1106_s13 + $0x48] sm:$0xff] }
  0x37   : > { %vm255_vm4 = vmand %vm250_vm0, %vm253_vm2  ;;  %v453_v16 = vstv %s1103_s12  ;;  %v263_v31 = vld [vmem:[%s1106_s13 + $0x20] sm:$0xff]  ;;  %v265_v32 = vld [vmem:[%s1106_s13 + $0x30] sm:$0xff]  ;;  %s1224_s4 = scalar_lea.vmem %s1090_s9, %s767_s30  ;;  %s1337_s8 = sld [smem:[#allocation4 + %s205_s7]] }
  0x38   : > { %vm256_vm5 = vmand %vm251_vm1, %vm254_vm3  ;;  %v277_v18 = vsel %vm255_vm4, 1, %v964_v17  ;;  %v454_v19 = vadd.s32 %v453_v16, %v1071_v1  ;;  %v267_v36 = vld [vmem:[%s1106_s13 + $0x40] sm:$0xff]  ;;  %v269_v37 = vld [vmem:[%s1106_s13 + $0x50] sm:$0xff]  ;;  %v455_v45 = vadd.s32 %v453_v16, %v1076_v2  ;;  %s223_s9 = sadd.s32 9, %s1059_s23  ;;  %s173_s28 = sand.u32 1, %s937_s15  }
  0x39   : > { %v278_v21 = vsel %vm256_vm5, 1, %v964_v17  ;;  %v282_v22 = vrot.slane %v277_v18, %v1083_v6  ;;  %v1118_v23 = vrot.slane %v277_v18, %v285_v9  ;;  %v1122_v24 = vrot.slane %v277_v18, %v289_v10  ;;  %v271_v38 = vld [vmem:[%s1106_s13 + $0x60] sm:$0xff]  ;;  %v273_v39 = vld [vmem:[%s1106_s13 + $0x70] sm:$0xff]  ;;  %s1365_s12 = sld [smem:[#allocation4 + %s223_s9]]  ;;  %p450_p1 = scmp.le.s32.totalorder %s1085_s6, %s1069_s17 }
  0x3a   : > { %v1127_v26 = vrot.slane %v277_v18, %v293_v11  ;;  %v1131_v27 = vrot.slane %v277_v18, %v297_v12  ;;  %v1135_v28 = vrot.slane %v277_v18, %v301_v13  ;;  %v1139_v29 = vrot.slane %v277_v18, %v305_v14  ;;  %v275_v46 = vld [vmem:[%s1106_s13 + $0x80] sm:$0xff]  ;;  %s653_s7 = sadd.s32 1, %s1059_s23  ;;  %s1520_s9 = sshll.u32 %s173_s28, 2 }
  0x3b   : > { %v1148_v33 = vrot.slane %v277_v18, %v309_v15  ;;  %v314_v34 = vrot.slane %v278_v21, %v1083_v6  ;;  %vm1151_vm7 = vcmp.ne.s32.totalorder %v282_v22, 0  ;;  %vm316_vm8 = vcmp.ne.s32.totalorder %v1118_v23, 0  ;;  %p207_p7 = scmp.lt.s32.totalorder %s1156_s25, 7  ;;  %v260_v22 = vld [vmem:[%s1106_s13 + $0x8] sm:$0xff]  ;;  %v474_v35 = vld [vmem:[%s1224_s4 + $0x40] sm:$0xff]  ;;  %v477_v23 = vld [vmem:[%s1224_s4 + $0x58] sm:$0xff] }
  0x3c   : > { %vm317_vm9 = vcmp.ne.s32.totalorder %v1122_v24, 0  ;;  %vm318_vm10 = vcmp.ne.s32.totalorder %v1127_v26, 0  ;;  %vm319_vm11 = vcmp.ne.s32.totalorder %v1131_v27, 0  ;;  %vm320_vm12 = vcmp.ne.s32.totalorder %v1135_v28, 0  ;;  %p225_p8 = scmp.lt.s32.totalorder %s1214_s16, 7  ;;  %s1696_s7 = smov (!%p1041_p10, %s653_s7), 0 }
  0x3d   : > { %vm321_vm13 = vcmp.ne.s32.totalorder %v1139_v29, 0  ;;  %vm1644_vm14 = vcmp.ne.s32.totalorder %v1148_v33, 0  ;;  %v342_v40 = vsel %vm1151_vm7, %v259_v25, -3.4028235e+38  ;;  %v344_v42 = vsel %vm316_vm8, %v261_v30, -3.4028235e+38  ;;  %p220_p9 = scmp.le.s32.totalorder %s1337_s8, %s1156_s25 }
  0x3e   : > { %v346_v43 = vsel %vm317_vm9, %v263_v31, -3.4028235e+38  ;;  %v348_v44 = vsel %vm318_vm10, %v265_v32, -3.4028235e+38  ;;  %vm1179_vm15 = vcmp.ne.s32.totalorder %v314_v34, 0  ;;  %vm1187_vm0 = vcmp.ge.s32.totalorder %v454_v19, %v456_v20  ;;  %s1221_s3 = scalar_select %p207_p7, %s1156_s25, 7 }
  0x3f   : > { %v350_v48 = vsel %vm319_vm11, %v267_v36, -3.4028235e+38  ;;  %v352_v49 = vsel %vm320_vm12, %v269_v37, -3.4028235e+38  ;;  %v354_v51 = vsel %vm321_vm13, %v271_v38, -3.4028235e+38  ;;  %vm460_vm1 = vcmp.lt.s32.totalorder %v454_v19, %v459_v41  ;;  %p238_p11 = scmp.le.s32.totalorder %s1365_s12, %s1214_s16  ;;  %p1475_p12 = por %p243_p6, %p220_p9 }
  0x40   : > { %v356_v52 = vsel %vm1644_vm14, %v273_v39, -3.4028235e+38  ;;  %v361_v53 = vsel %vm360_vm6, %v342_v40, -inf  ;;  %v362_v54 = vsel %vm360_vm6, %v344_v42, -inf  ;;  %v363_v55 = vsel %vm360_vm6, %v346_v43, -inf  ;;  %vm462_vm4 = vmand %vm1187_vm0, %vm460_vm1  ;;  %v262_v31 = vld [vmem:[%s1106_s13 + $0x18] sm:$0xff]  ;;  %p1540_p2 = por %p450_p1, %p220_p9 }
  0x41   : > { %v365_v56 = vsel %vm360_vm6, %v348_v44, -inf  ;;  %v367_v57 = vsel %vm360_vm6, %v350_v48, -inf  ;;  %v369_v58 = vsel %vm360_vm6, %v352_v49, -inf  ;;  %v358_v59 = vsel %vm1179_vm15, %v275_v46, -3.4028235e+38  ;;  %v264_v34 = vld [vmem:[%s1106_s13 + $0x28] sm:$0xff]  ;;  %p1499_p0 = por %p243_p6, %p238_p11  ;;  %p1565_p3 = por %p450_p1, %p238_p11 }
  0x42   : > { %v364_v60 = vmax.f32 %v361_v53, %v363_v55  ;;  %v366_v61 = vmax.f32 %v362_v54, %v365_v56  ;;  %v371_v62 = vsel %vm360_vm6, %v354_v51, -inf  ;;  %v373_v63 = vsel %vm360_vm6, %v356_v52, -inf  ;;  %v266_v36 = vld [vmem:[%s1106_s13 + $0x38] sm:$0xff]  ;;  %v467_v37 = vld [vmem:[%s1224_s4 + $0x8] sm:$0xff]  ;;  %v468_v38 = vld [vmem:[%s1224_s4 + $0x10] sm:$0xff]  ;;  %s1360_s10 = scalar_select %p225_p8, %s1214_s16, 7 }
  0x43   : > { %vm1206_vm2 = vcmp.ge.s32.totalorder %v455_v45, %v456_v20  ;;  %vm461_vm3 = vcmp.lt.s32.totalorder %v455_v45, %v459_v41  ;;  %v375_v5 = vsel %vm360_vm6, %v358_v59, -inf  ;;  %v484_v16 = vsel %vm462_vm4, 1, %v964_v17  ;;  %v469_v40 = vld [vmem:[%s1224_s4 + $0x18] sm:$0xff]  ;;  %v470_v41 = vld [vmem:[%s1224_s4 + $0x20] sm:$0xff]  ;;  %v471_v42 = vld [vmem:[%s1224_s4 + $0x28] sm:$0xff]  ;;  %s1590_s30 = scalar_lea.sflag [#allocation6], %s173_s28 }
  0x44   : > { %v368_v0 = vmax.f32 %v364_v60, %v367_v57  ;;  %v370_v3 = vmax.f32 %v366_v61, %v369_v58  ;;  %vm463_vm5 = vmand %vm1206_vm2, %vm461_vm3  ;;  %v489_v21 = vrot.slane %v484_v16, %v1083_v6  ;;  %v493_v25 = vrot.slane %v484_v16, %v285_v9  ;;  %v472_v43 = vld [vmem:[%s1224_s4 + $0x30] sm:$0xff]  ;;  %v475_v45 = vld [vmem:[%s1224_s4 + $0x48] sm:$0xff]  ;;  %s1455_s24 = scalar_lea.vmem [#allocation2], %s1360_s10 }
  0x45   : > { %v485_v20 = vsel %vm463_vm5, 1, %v964_v17  ;;  %v497_v30 = vrot.slane %v484_v16, %v289_v10  ;;  %v501_v32 = vrot.slane %v484_v16, %v293_v11  ;;  %v505_v17 = vrot.slane %v484_v16, %v297_v12  ;;  %v466_v10 = vld [vmem:[%s1224_s4] sm:$0xff]  ;;  %v476_v49 = vld [vmem:[%s1224_s4 + $0x50] sm:$0xff]  ;;  %v479_v52 = vld [vmem:[%s1224_s4 + $0x68] sm:$0xff]  ;;  %s441_s26 = scalar_select %p1499_p0, 1, 0 }
  0x46   : > { %v372_v7 = vmax.f32 %v368_v0, %v371_v62  ;;  %v374_v8 = vmax.f32 %v370_v3, %v373_v63  ;;  %v509_v9 = vrot.slane %v484_v16, %v301_v13  ;;  %v513_v11 = vrot.slane %v484_v16, %v305_v14  ;;  %v478_v51 = vld [vmem:[%s1224_s4 + $0x60] sm:$0xff]  ;;  %v480_v53 = vld [vmem:[%s1224_s4 + $0x70] sm:$0xff]  ;;  %s637_s17 = scalar_select %p1565_p3, 1, 0 }
  0x47   : > { %v1251_v12 = vrot.slane %v484_v16, %v309_v15  ;;  %v521_v39 = vrot.slane %v485_v20, %v1083_v6  ;;  %v343_v13 = vsel %vm1151_vm7, %v260_v22, -3.4028235e+38  ;;  %vm1261_vm0 = vcmp.ne.s32.totalorder %v489_v21, 0  ;;  %v473_v15 = vld [vmem:[%s1224_s4 + $0x38] sm:$0xff]  ;;  %v1293_v54 = vld [vmem:[%s1224_s4 + $0x80] sm:$0xff] }
  0x48   : > { %v376_v18 = vmax.f32 %v372_v7, %v375_v5  ;;  %v1267_v14 = vsel %vm316_vm8, %v262_v31, -3.4028235e+38  ;;  %v209_v6 = vstv %s1221_s3  ;;  %vm523_vm7 = vcmp.ne.s32.totalorder %v493_v25, 0  ;;  %v270_v5 = vld [vmem:[%s1106_s13 + $0x58] sm:$0xff]  ;;  %v272_v7 = vld [vmem:[%s1106_s13 + $0x68] sm:$0xff] }
  0x49   : > { %vm524_vm1 = vcmp.ne.s32.totalorder %v497_v30, 0  ;;  %v347_v46 = vsel %vm317_vm9, %v264_v34, -3.4028235e+38  ;;  %v349_v48 = vsel %vm318_vm10, %v266_v36, -3.4028235e+38  ;;  %vm525_vm8 = vcmp.ne.s32.totalorder %v501_v32, 0 }
  0x4a   : > { %v377_v19 = vmax.f32 %v376_v18, %v374_v8  ;;  %vm526_vm2 = vcmp.ne.s32.totalorder %v505_v17, 0  ;;  %vm527_vm3 = vcmp.ne.s32.totalorder %v509_v9, 0  ;;  %v1280_v50 = vsel %vm360_vm6, %v343_v13, -inf  ;;  %v274_v21 = vld [vmem:[%s1106_s13 + $0x78] sm:$0xff] }
  0x4b   : > { %vm528_vm4 = vcmp.ne.s32.totalorder %v513_v11, 0  ;;  %vm529_vm5 = vcmp.ne.s32.totalorder %v1251_v12, 0  ;;  %vm1285_vm14 = vcmp.ne.s32.totalorder %v521_v39, 0  ;;  %v549_v26 = vsel %vm1261_vm0, %v466_v10, -3.4028235e+38  ;;  %v276_v11 = vld [vmem:[%s1106_s13 + $0x88] sm:$0xff] }
  0x4c   : > { %395 = vst.msk [vmem:[#allocation2] sm:$0xff] %vm360_vm6, %v377_v19  ;;  %v550_v55 = vsel %vm1261_vm0, %v467_v37, -3.4028235e+38  ;;  %v551_v56 = vsel %vm523_vm7, %v468_v38, -3.4028235e+38  ;;  %v212_v58 = vstv %s1156_s25  ;;  %v1304_v62 = vadd.s32 %v209_v6, %v1071_v1  ;;  %s1450_s13 = scalar_lea.vmem [#allocation2], %s1221_s3 }
  0x4d   : > { %v553_v57 = vsel %vm524_vm1, %v470_v41, -3.4028235e+38  ;;  %v552_v59 = vsel %vm523_vm7, %v469_v40, -3.4028235e+38  ;;  %v554_v60 = vsel %vm524_vm1, %v471_v42, -3.4028235e+38  ;;  %v1313_v8 = vadd.s32 %v209_v6, %v1076_v2 }
  0x4e   : > { %v555_v61 = vsel %vm525_vm8, %v472_v43, -3.4028235e+38  ;;  %v556_v63 = vsel %vm525_vm8, %v473_v15, -3.4028235e+38  ;;  %v557_v0 = vsel %vm526_vm2, %v474_v35, -3.4028235e+38  ;;  %vm1392_vm10 = vcmp.ge.s32.totalorder %v1304_v62, %v212_v58 }
  0x4f   : > { %v558_v3 = vsel %vm526_vm2, %v475_v45, -3.4028235e+38  ;;  %v559_v16 = vsel %vm527_vm3, %v476_v49, -3.4028235e+38  ;;  %v560_v18 = vsel %vm527_vm3, %v477_v23, -3.4028235e+38 }
  0x50   : > { %v567_v19 = vsel %vm360_vm6, %v549_v26, -inf  ;;  %v569_v20 = vsel %vm360_vm6, %v553_v57, -inf  ;;  %v561_v22 = vsel %vm528_vm4, %v478_v51, -3.4028235e+38  ;;  %v562_v25 = vsel %vm528_vm4, %v479_v52, -3.4028235e+38 }
  0x51   : > { %v584_v30 = vsel %vm360_vm6, %v550_v55, -inf  ;;  %v586_v31 = vsel %vm360_vm6, %v554_v60, -inf  ;;  %v563_v32 = vsel %vm529_vm5, %v480_v53, -3.4028235e+38  ;;  %v565_v17 = vsel %vm1285_vm14, %v1293_v54, -3.4028235e+38 }
  0x52   : > { %v568_v9 = vsel %vm360_vm6, %v551_v56, -inf  ;;  %v571_v34 = vsel %vm360_vm6, %v555_v61, -inf  ;;  %v570_v36 = vmax.f32 %v567_v19, %v569_v20  ;;  %v573_v10 = vsel %vm360_vm6, %v557_v0, -inf  ;;  %v483_v49 = vld [vmem:[%s1224_s4 + $0x88] sm:$0xff]  ;;  %s417_s3 = scalar_select %p1475_p12, 1, 0 }
  0x53   : > { %v575_v37 = vsel %vm360_vm6, %v559_v16, -inf  ;;  %v585_v38 = vsel %vm360_vm6, %v552_v59, -inf  ;;  %v587_v39 = vmax.f32 %v584_v30, %v586_v31  ;;  %v351_v13 = vsel %vm319_vm11, %v268_v4, -3.4028235e+38 }
  0x54   : > { %v353_v40 = vsel %vm320_vm12, %v270_v5, -3.4028235e+38  ;;  %v355_v41 = vsel %vm321_vm13, %v272_v7, -3.4028235e+38  ;;  %v588_v42 = vsel %vm360_vm6, %v556_v63, -inf  ;;  %vm1659_vm9 = vcmp.ne.s32.totalorder %v1148_v33, 0 }
  0x55   : > { %v357_v43 = vsel %vm1659_vm9, %v274_v21, -3.4028235e+38  ;;  %v379_v44 = vsel %vm360_vm6, %v1267_v14, -inf  ;;  %v380_v6 = vsel %vm360_vm6, %v347_v46, -inf  ;;  %v590_v27 = vsel %vm360_vm6, %v558_v3, -inf  ;;  %v481_v46 = vld [vmem:[%s1224_s4 + $0x78] sm:$0xff] }
  0x56   : > { %v359_v28 = vsel %vm1179_vm15, %v276_v11, -3.4028235e+38  ;;  %v381_v29 = vmax.f32 %v1280_v50, %v380_v6  ;;  %v382_v15 = vsel %vm360_vm6, %v349_v48, -inf  ;;  %v384_v33 = vsel %vm360_vm6, %v351_v13, -inf  ;;  %s778_s4 = scalar_select %p1041_p10, [#allocation4], [#allocation7] }
  0x57   : > { %v383_v35 = vmax.f32 %v379_v44, %v382_v15  ;;  %v386_v45 = vsel %vm360_vm6, %v353_v40, -inf  ;;  %v388_v14 = vsel %vm360_vm6, %v355_v41, -inf  ;;  %v572_v47 = vmax.f32 %v568_v9, %v571_v34 }
  0x58   : > { %v574_v23 = vmax.f32 %v570_v36, %v573_v10  ;;  %v385_v50 = vmax.f32 %v381_v29, %v384_v33  ;;  %v390_v48 = vsel %vm360_vm6, %v357_v43, -inf  ;;  %v589_v51 = vmax.f32 %v585_v38, %v588_v42 }
  0x59   : > { %v591_v52 = vmax.f32 %v587_v39, %v590_v27  ;;  %v387_v26 = vmax.f32 %v383_v35, %v386_v45  ;;  %v392_v53 = vsel %vm360_vm6, %v359_v28, -inf  ;;  %v577_v54 = vsel %vm360_vm6, %v561_v22, -inf }
  0x5a   : > { %v592_v55 = vsel %vm360_vm6, %v560_v18, -inf  ;;  %v594_v56 = vsel %vm360_vm6, %v562_v25, -inf  ;;  %v389_v57 = vmax.f32 %v385_v50, %v388_v14  ;;  %v564_v59 = vsel %vm529_vm5, %v481_v46, -3.4028235e+38 }
  0x5b   : > { %v566_v60 = vsel %vm1285_vm14, %v483_v49, -3.4028235e+38  ;;  %v391_v61 = vmax.f32 %v387_v26, %v390_v48  ;;  %v227_v63 = vstv %s1360_s10  ;;  %v576_v0 = vmax.f32 %v572_v47, %v575_v37  ;;  %s654_s10 = sld [smem:[%s778_s4 + %s1696_s7]] }
  0x5c   : > { %v579_v3 = vsel %vm360_vm6, %v563_v32, -inf  ;;  %v393_v4 = vmax.f32 %v389_v57, %v392_v53  ;;  %v215_v5 = vstv %s1337_s8  ;;  %v578_v7 = vmax.f32 %v574_v23, %v577_v54  ;;  %s617_s8 = scalar_select %p1540_p2, 1, 0 }
  0x5d   : > { %v581_v16 = vsel %vm360_vm6, %v565_v17, -inf  ;;  %v593_v18 = vmax.f32 %v589_v51, %v592_v55  ;;  %v595_v12 = vmax.f32 %v591_v52, %v594_v56  ;;  %v596_v19 = vsel %vm360_vm6, %v564_v59, -inf }
  0x5e   : > { %v598_v24 = vsel %vm360_vm6, %v566_v60, -inf  ;;  %v394_v20 = vmax.f32 %v393_v4, %v391_v61  ;;  %v228_v21 = vadd.s32 %v227_v63, %v1071_v1  ;;  %v229_v22 = vadd.s32 %v227_v63, %v1076_v2 }
  0x5f   : > { %v230_v25 = vstv %s1214_s16  ;;  %v233_v30 = vstv %s1365_s12  ;;  %v580_v31 = vmax.f32 %v576_v0, %v579_v3  ;;  %vm1399_vm11 = vcmp.ge.s32.totalorder %v1313_v8, %v212_v58 }
  0x60   : > { %396 = vst.msk [vmem:[#allocation2 + $0x8] sm:$0xff] %vm360_vm6, %v394_v20  ;;  %vm1404_vm12 = vcmp.lt.s32.totalorder %v1304_v62, %v215_v5  ;;  %v582_v2 = vmax.f32 %v578_v7, %v581_v16  ;;  %v597_v9 = vmax.f32 %v593_v18, %v596_v19  ;;  %v599_v34 = vmax.f32 %v595_v12, %v598_v24 }
  0x61   : > { %vm1409_vm13 = vcmp.lt.s32.totalorder %v1313_v8, %v215_v5  ;;  %vm1413_vm14 = vcmp.ge.s32.totalorder %v228_v21, %v230_v25  ;;  %vm1417_vm15 = vcmp.lt.s32.totalorder %v228_v21, %v233_v30  ;;  %vm218_vm0 = vmand %vm1392_vm10, %vm1404_vm12  ;;  %vm1425_vm7 = vcmp.ge.s32.totalorder %v229_v22, %v230_v25  ;;  %s777_s16 = sshll.u32 %s654_s10, 6 }
  0x62   : > { %vm1429_vm1 = vcmp.lt.s32.totalorder %v229_v22, %v233_v30  ;;  %vm219_vm8 = vmand %vm1399_vm11, %vm1409_vm13  ;;  %v583_v37 = vmax.f32 %v582_v2, %v580_v31  ;;  %v600_v38 = vmax.f32 %v599_v34, %v597_v9  ;;  %vm407_vm3 = vcmask 24576   ;;  %s1585_s27 = scalar_lea.hbm %s1643_s2, %s777_s16 }
  0x63   : > { %vm236_vm2 = vmand %vm1413_vm14, %vm1417_vm15  ;;  %v418_v47 = vstv %s417_s3  ;;  %v442_v52 = vstv %s441_s26  ;;  %v618_v31 = vstv %s617_s8  ;;  %v638_v2 = vstv %s637_s17  ;;  %s965_s26 = smov [#allocation5]  }
  0x64   : > { %vm237_vm4 = vmand %vm1425_vm7, %vm1429_vm1  ;;  %vm419_vm5 = vcmp.eq.s32.totalorder %v418_v47, 1  ;;  %vm443_vm9 = vcmp.eq.s32.totalorder %v442_v52, 1  ;;  %vm639_vm10 = vcmp.eq.s32.totalorder %v638_v2, 1  ;;  %s871_s4 = sshll.u32 %s965_s26, 4  ;;  %s872_s4 = int_to_ptr.vmem [resolvable:$false] %s871_s4 }
  0x65   : > { %s873_s7 = scalar_lea.vmem %s872_s4, 128 }
  0x67   : > { %v398_v11 = vld [vmem:[%s1450_s13] sm:$0xff]  ;;  %v399_v39 = vld [vmem:[%s1450_s13 + $0x8] sm:$0x1] }
  0x68   : > { %v423_v13 = vld [vmem:[%s1455_s24] sm:$0xff]  ;;  %v424_v40 = vld [vmem:[%s1455_s24 + $0x8] sm:$0x1]  ;;  %v404_v41 = vsel %vm218_vm0, %v398_v11, -3.4028235e+38 }
  0x69   : > { %v405_v42 = vsel %vm219_vm8, %v399_v39, -3.4028235e+38  ;;  %601 = vst.msk [vmem:[#allocation2] sm:$0xff] %vm360_vm6, %v583_v37  ;;  %602 = vst.msk [vmem:[#allocation2 + $0x8] sm:$0xff] %vm360_vm6, %v600_v38  ;;  %v406_v43 = vsel %vm360_vm6, %v404_v41, -inf }
  0x6a   : > { %v408_v44 = vsel %vm407_vm3, %v405_v42, -inf  ;;  %v429_v6 = vsel %vm236_vm2, %v423_v13, -3.4028235e+38  ;;  %v430_v27 = vsel %vm237_vm4, %v424_v40, -3.4028235e+38 }
  0x6b   : > { %v409_v28 = vmax.f32 %v406_v43, %v408_v44  ;;  %v431_v29 = vsel %vm360_vm6, %v429_v6, -inf  ;;  %v432_v15 = vsel %vm407_vm3, %v430_v27, -inf }
  0x6c   : > { %v433_v35 = vmax.f32 %v431_v29, %v432_v15 }
  0x6d   : > { %v410_v33 = vrot.slane %v409_v28, 4 }
  0x6e   : > { %v434_v45 = vrot.slane %v433_v35, 4 }
  0x6f   : > { %v411_v14 = vmax.f32 %v409_v28, %v410_v33 }
  0x70   : > { %v435_v46 = vmax.f32 %v433_v35, %v434_v45  ;;  %v603_v23 = vld [vmem:[%s1450_s13] sm:$0xff]  ;;  %v604_v50 = vld [vmem:[%s1450_s13 + $0x8] sm:$0x1]  ;;  %s175_s13 = scalar_lea.vmem [#allocation5], %s1520_s9 }
  0x71   : > { %v412_v49 = vrot.slane %v411_v14, 2  ;;  %v623_v48 = vld [vmem:[%s1455_s24] sm:$0xff]  ;;  %v605_v26 = vsel %vm218_vm0, %v603_v23, -3.4028235e+38  ;;  %v606_v53 = vsel %vm219_vm8, %v604_v50, -3.4028235e+38 }
  0x72   : > { %v436_v51 = vrot.slane %v435_v46, 2  ;;  %v607_v55 = vsel %vm360_vm6, %v605_v26, -inf  ;;  %v608_v56 = vsel %vm407_vm3, %v606_v53, -inf  ;;  %v624_v57 = vld [vmem:[%s1455_s24 + $0x8] sm:$0x1]  ;;  %s662_s6 = sshll.u32 %s175_s13, 4  ;;  %s1579_s6 = int_to_ptr.vmem [resolvable:$true] %s662_s6 }
  0x73   : > { %v413_v54 = vmax.f32 %v411_v14, %v412_v49  ;;  %v625_v59 = vsel %vm236_vm2, %v623_v48, -3.4028235e+38  ;;  %v609_v61 = vmax.f32 %v607_v55, %v608_v56  ;;  %v626_v63 = vsel %vm237_vm4, %v624_v57, -3.4028235e+38  ;;  %s867_s3 = scalar_lea.vmem %s1579_s6, 64  ;;  %p874_p7 = scmp.lt.s32.totalorder %s1579_s6, %s872_s4 }
  0x74   : > { %v437_v60 = vmax.f32 %v435_v46, %v436_v51  ;;  %v627_v0 = vsel %vm360_vm6, %v625_v59, -inf  ;;  %v628_v4 = vsel %vm407_vm3, %v626_v63, -inf  ;;  %vm619_vm6 = vcmp.eq.s32.totalorder %v618_v31, 1  ;;  %p868_p4 = scmp.ne.s32.totalorder %s1579_s6, %s867_s3  ;;  %p875_p8 = scmp.lt.s32.totalorder %s873_s7, %s867_s3 }
  0x75   : > { %v414_v3 = vrot.slane %v413_v54, 1  ;;  %v610_v7 = vrot.slane %v609_v61, 4  ;;  %v629_v16 = vmax.f32 %v627_v0, %v628_v4 }
  0x76   : > { %v438_v5 = vrot.slane %v437_v60, 1  ;;  %p869_p5 = pnand %p868_p4, %p1041_p10  ;;  %p876_p9 = por %p875_p8, %p874_p7 }
  0x77   : > { %v415_v18 = vmax.f32 %v413_v54, %v414_v3  ;;  %v611_v19 = vmax.f32 %v609_v61, %v610_v7  ;;  %v630_v24 = vrot.slane %v629_v16, 4 }
  0x78   : > { %v439_v12 = vmax.f32 %v437_v60, %v438_v5  ;;  %p870_p6 = pneg %p869_p5 }
  0x79   : > { %v420_v20 = vsel %vm419_vm5, 0.0, %v415_v18  ;;  %v612_v22 = vrot.slane %v611_v19, 2  ;;  %v631_v25 = vmax.f32 %v629_v16, %v630_v24 }
  0x7a   : > { %421 = vst.msk [vmem:[%s175_s13] sm:$0x1] %vm407_vm3, %v420_v20  ;;  %v444_v21 = vsel %vm443_vm9, 0.0, %v439_v12  ;;  %p877_p11 = pnand %p876_p9, %p870_p6 }
  0x7b   : > { %445 = vst.msk [vmem:[%s175_s13 + $0x1] sm:$0x1] %vm407_vm3, %v444_v21  ;;  %v613_v30 = vmax.f32 %v611_v19, %v612_v22  ;;  %v632_v32 = vrot.slane %v631_v25, 2 }
  0x7d   : > { %v614_v17 = vrot.slane %v613_v30, 1  ;;  %v633_v1 = vmax.f32 %v631_v25, %v632_v32 }
  0x7f   : > { %v615_v9 = vmax.f32 %v613_v30, %v614_v17  ;;  %v634_v34 = vrot.slane %v633_v1, 1 }
  0x81   : > { %v620_v36 = vsel %vm619_vm6, 0.0, %v615_v9  ;;  %v635_v58 = vmax.f32 %v633_v1, %v634_v34 }
  0x82   : > { %768 = vst.msk [vmem:[%s175_s13 + $0x2] sm:$0x1] %vm407_vm3, %v620_v36 }
  0x83   : > { %v640_v10 = vsel %vm639_vm10, 0.0, %v635_v58 }
  0x84   : > { %769 = vst.msk [vmem:[%s175_s13 + $0x3] sm:$0x1] %vm407_vm3, %v640_v10 }
  0x85   : > { %880 = shalt.err (!%p877_p11)
}
  0x86   : > { %s881_s28 = scalar_lea.hbm %s1585_s27, 64  ;;  %s885_s25 = scalar_lea.hbm %s1643_s2, 256 }
  0x87   : > { %p882_p12 = scmp.ne.s32.totalorder %s1585_s27, %s881_s28  ;;  %p886_p2 = scmp.lt.s32.totalorder %s1585_s27, %s1643_s2 }
  0x88   : > { %p887_p3 = scmp.lt.s32.totalorder %s885_s25, %s881_s28 }
  0x89   : > { %p883_p0 = pnand %p882_p12, %p1041_p10 }
  0x8a   : > { %p888_p4 = por %p887_p3, %p886_p2 }
  0x8b   : > { %p884_p1 = pneg %p883_p0 }
  0x8d   : > { %p889_p5 = pnand %p888_p4, %p884_p1 }
  0x8f   : > { %892 = shalt.err (!%p889_p5)
}
  0x90   : > { %s966_s13 = smov 32   ;;  %s967_s17 = smov 2  }
  0x91   : > { %780 = dma.vmem_to_hbm [thread:$0]  (%p1041_p10), %s1579_s6, 64, %s1585_s27, %s1590_s30, %s966_s13, %s966_s13, %s967_s17  }
  0x92 PF: > { %p786_p6 = scmp.ge.s32.totalorder %s961_s20, 2  ;;  %s677_s16 = sand.u32 1, %s933_s14  }
  0x93   : > { %s678_s12 = scalar_lea.sflag [#allocation6], %s677_s16 }
  0x94   : > { %p783_p7 = pnand %p786_p6, %p1048_p13 }
  0x96   : > { %p784_p8 = pneg %p783_p7 }
  0x98   : > { %928 = dma.done.wait (%p784_p8), %s678_s12, 64  }
  0x99   : > { %930 = vsyncadd (%p784_p8), %s678_s12, 4294967232  ;;  %s21_s20 = sadd.s32 1, %s961_s20   ;;  %s1680_s14 = smov %s937_s15 }
  0x9a   : > { %p18_p9 = scmp.ge.s32.totalorder %s21_s20, 6   ;;  %s1681_s15 = smov %s941_s0 }
  0x9b   : > { %s1682_s0 = smov %s1055_s11  ;;  %s1683_s16 = smov %s953_s18 }
  0x9c   : > { %s1684_s17 = smov %s957_s19  ;;  %s1685_s18 = smov %s1688_s21 }
  0x9d   : > { %s1686_s19 = smov %s1692_s22  ;;  %20 = sbr.rel (!%p18_p9) target bundleno = 20 (0x14), region = 64 }
  0xa2   :  { %683 = vsyncpa [#allocation6], 1 }
  0xa3   :  { %685 = vsyncpa [#allocation6 + $0x1], 1 }

</bundles_post_ra>
